<compile_context>
chip_gen: v6e
topology: v6e:2x2x1
jax: 0.10.0
libtpu: 0.0.40
codegen_flags: <defaults>
</compile_context>

<pallas_src>
import functools

import jax
import jax.numpy as jnp
import numpy as np
from jax.experimental import pallas as pl
from jax.experimental.pallas import tpu as pltpu

EPS = 1e-5  # PyTorch BatchNorm1d default eps


def _round_up(x, m):
    return (x + m - 1) // m * m


def encoder_head_kernel(x_ref, w_ref, gamma_ref, beta_ref,
                        out_ref, lin_ref, sum_ref, sumsq_ref, *, n_valid):
    # x_ref:        [TN, HW, C]   bf16 channels-last feature-map tile (streamed)
    # w_ref:        [C, E_pad]    bf16 linear weight (pre-transposed), resident
    # gamma/beta:   [1, E_pad]    f32, resident
    # out_ref:      [N_pad, E_pad] f32, resident across the grid
    # lin_ref:      [N_pad, E_pad] f32 VMEM scratch holding Linear outputs
    # sum_ref/sumsq_ref: [1, E_pad] f32 streamed BN statistics accumulators
    i = pl.program_id(0)
    tn, hw, _ = x_ref.shape

    @pl.when(i == 0)
    def _():
        sum_ref[...] = jnp.zeros_like(sum_ref)
        sumsq_ref[...] = jnp.zeros_like(sumsq_ref)

    # Global average pool over spatial (sublane reduce), f32 accumulation.
    pooled = jnp.sum(x_ref[...].astype(jnp.float32), axis=1) * (1.0 / hw)

    # Linear (bias-free; bias cancels under training-mode BN): native bf16 MXU
    # matmul with f32 accumulation.
    lin = jnp.dot(pooled.astype(jnp.bfloat16), w_ref[...],
                  preferred_element_type=jnp.float32)        # [TN, E_pad] f32

    # Stage the Linear output and stream the BN sum / sum-of-squares.
    lin_ref[pl.ds(pl.multiple_of(i * tn, tn), tn), :] = lin
    sum_ref[...] += jnp.sum(lin, axis=0, keepdims=True)
    sumsq_ref[...] += jnp.sum(lin * lin, axis=0, keepdims=True)

    # Finalize BatchNorm1d (training-mode batch stats, biased variance) once
    # all batch tiles have been streamed.  Zero-padded batch rows produce
    # exactly-zero lin (no bias), so they contribute nothing to the sums.
    @pl.when(i == pl.num_programs(0) - 1)
    def _():
        inv_n = 1.0 / n_valid
        mu = sum_ref[...] * inv_n                            # [1, E_pad]
        var = jnp.maximum(sumsq_ref[...] * inv_n - mu * mu, 0.0)
        inv_std = jax.lax.rsqrt(var + EPS)
        out_ref[...] = ((lin_ref[...] - mu) * inv_std * gamma_ref[...]
                        + beta_ref[...]).astype(out_ref.dtype)
    # TODO(synk): running_mean/running_var update (momentum=0.01) is a training
    # side-effect that does not affect this forward output; not implemented.


def encoder_cnn_forward(feats_nchw, w_lin, b_lin, gamma, beta,
                        *, block_n=32, stream_dtype=jnp.bfloat16):
    """feats_nchw: [N, C, H, W] backbone feature maps; returns [N, E] (f32).

    b_lin is accepted for API parity with nn.Linear but is not used inside the
    kernel: the Linear bias cancels exactly under training-mode BatchNorm.
    """
    N, C, H, W = feats_nchw.shape
    E = w_lin.shape[0]
    HW = H * W

    # Channels-last so C is lane-dense inside the kernel.
    # TODO(synk): if the backbone already emits NHWC (typical for JAX convs),
    # consume it directly -- this transpose+cast is an extra HBM pass over the
    # full feature tensor and dominates end-to-end time for real ResNet feats.
    x = jnp.transpose(feats_nchw, (0, 2, 3, 1)).reshape(N, HW, C)
    x = x.astype(stream_dtype)

    tn = max(8, min(_round_up(block_n, 8), _round_up(N, 8)))
    assert tn % 8 == 0
    n_pad = _round_up(N, tn)
    e_pad = _round_up(E, 128)

    if n_pad != N:
        x = jnp.pad(x, ((0, n_pad - N), (0, 0), (0, 0)))

    w_t = jnp.asarray(w_lin).T.astype(stream_dtype)            # [C, E]
    w_t = jnp.pad(w_t, ((0, 0), (0, e_pad - E)))
    g2 = jnp.pad(jnp.asarray(gamma, jnp.float32), (0, e_pad - E),
                 constant_values=1.0).reshape(1, e_pad)
    bt2 = jnp.pad(jnp.asarray(beta, jnp.float32), (0, e_pad - E)).reshape(1, e_pad)

    kernel = functools.partial(encoder_head_kernel, n_valid=N)

    x_bytes = int(x.size) * x.dtype.itemsize
    w_bytes = int(w_t.size) * w_t.dtype.itemsize
    cost = pl.CostEstimate(
        flops=2 * N * C * e_pad + N * HW * C + 8 * N * e_pad,
        transcendentals=0,
        bytes_accessed=x_bytes + w_bytes + n_pad * e_pad * 4,
    )

    # Explicit VMEM budget: double-buffered x tiles + resident weight +
    # resident out / lin slabs + small statistics buffers, with 2x headroom,
    # clamped so it stays inside v7x's 64 MiB physical VMEM.
    vmem_bytes = (2 * tn * HW * C * 2            # x double-buffer (bf16)
                  + 2 * C * e_pad * 2            # weight (bf16)
                  + 4 * 2 * e_pad * 4            # gamma/beta
                  + 2 * n_pad * e_pad * 4        # out + lin scratch (f32)
                  + 2 * e_pad * 4)               # sum/sumsq
    vmem_limit = int(min(max(2 * vmem_bytes, 32 * 1024 * 1024),
                         64 * 1024 * 1024))

    out = pl.pallas_call(
        kernel,
        out_shape=jax.ShapeDtypeStruct((n_pad, e_pad), jnp.float32),
        grid_spec=pltpu.PrefetchScalarGridSpec(
            num_scalar_prefetch=0,
            grid=(n_pad // tn,),
            in_specs=[
                pl.BlockSpec((tn, HW, C), lambda i: (i, 0, 0)),   # streamed x
                pl.BlockSpec((C, e_pad), lambda i: (0, 0)),       # resident W
                pl.BlockSpec((1, e_pad), lambda i: (0, 0)),       # gamma
                pl.BlockSpec((1, e_pad), lambda i: (0, 0)),       # beta
            ],
            out_specs=pl.BlockSpec((n_pad, e_pad), lambda i: (0, 0)),
            scratch_shapes=[
                pltpu.VMEM((n_pad, e_pad), jnp.float32),          # lin
                pltpu.VMEM((1, e_pad), jnp.float32),              # sum
                pltpu.VMEM((1, e_pad), jnp.float32),              # sumsq
            ],
        ),
        compiler_params=pltpu.CompilerParams(
            # The batch-grid axis is a reduction for the BatchNorm statistics;
            # output is written once on the final step -- keep it "arbitrary".
            dimension_semantics=("arbitrary",),
            vmem_limit_bytes=vmem_limit),
        cost_estimate=cost,
    )(x, w_t, g2, bt2)

    return out[:N, :E]


def reference_forward(feats_nchw, w_lin, b_lin, gamma, beta,
                      stream_dtype=jnp.bfloat16):
    # Pure-JAX reference mirroring the kernel's bf16 quantization of the
    # streamed operands (x, pooled, weight).  Bias is included here; it
    # cancels under training-mode BN so the output matches the bias-free
    # kernel path exactly (up to float rounding).
    f = feats_nchw.astype(stream_dtype).astype(jnp.float32)
    pooled = jnp.mean(f, axis=(2, 3))                          # [N, C]
    pooled = pooled.astype(stream_dtype).astype(jnp.float32)
    w = jnp.asarray(w_lin).astype(stream_dtype).astype(jnp.float32)
    lin = pooled @ w.T + jnp.asarray(b_lin, jnp.float32)
    mu = jnp.mean(lin, axis=0, keepdims=True)
    var = jnp.mean((lin - mu) ** 2, axis=0, keepdims=True)
    return (lin - mu) / jnp.sqrt(var + EPS) * gamma + beta


if __name__ == "__main__":
    # Small-shape stand-ins for ResNet-152 (real: C=2048, HW=49): batch=16,
    # C=256, 4x4 spatial, embed_size=192 (exercises the pad-E-to-128 path);
    # block_n=8 gives a 2-step pipelined grid over the batch so the streamed
    # BN-statistics path is exercised.
    N, C, H, W, E = 16, 256, 4, 4, 192

    key = jax.random.PRNGKey(0)
    k_feat, k_w, k_b = jax.random.split(key, 3)

    feats = jax.random.normal(k_feat, (N, C, H, W), dtype=jnp.float32)

    # Deterministic Linear init (PyTorch-style uniform bound), BN gamma=1 beta=0.
    bound = 1.0 / np.sqrt(C)
    w_lin = jax.random.uniform(k_w, (E, C), jnp.float32, -bound, bound)
    b_lin = jax.random.uniform(k_b, (E,), jnp.float32, -bound, bound)
    gamma = jnp.ones((E,), jnp.float32)
    beta = jnp.zeros((E,), jnp.float32)

    out = encoder_cnn_forward(feats, w_lin, b_lin, gamma, beta, block_n=8)
    out = jax.block_until_ready(out)
    assert out.shape == (N, E)

    ref = reference_forward(feats, w_lin, b_lin, gamma, beta)
    np.testing.assert_allclose(np.asarray(out), np.asarray(ref),
                               rtol=2e-3, atol=2e-3)
    print("KERNEL_OK")
</pallas_src>

<mosaic_0001>
module attributes {stable_mosaic.version = 11 : i64} {
  func.func @encoder_head_kernel(%arg0: i32, %arg1: memref<8x16x256xbf16, #tpu.memory_space<vmem>>, %arg2: memref<256x256xbf16, #tpu.memory_space<vmem>>, %arg3: memref<1x256xf32, #tpu.memory_space<vmem>>, %arg4: memref<1x256xf32, #tpu.memory_space<vmem>>, %arg5: memref<16x256xf32, #tpu.memory_space<vmem>>, %arg6: memref<16x256xf32, #tpu.memory_space<vmem>>, %arg7: memref<1x256xf32, #tpu.memory_space<vmem>>, %arg8: memref<1x256xf32, #tpu.memory_space<vmem>>) attributes {dimension_semantics = [#tpu.dimension_semantics<arbitrary>], iteration_bounds = array<i64: 2>, scalar_prefetch = 0 : i64, scratch_operands = 3 : i64, tpu.core_type = #tpu.core_type<tc>, window_params = [{transform_indices = @transform_0, window_bounds = array<i64: 8, 16, 256>}, {pipeline_mode = #tpu.pipeline_mode<synchronous>, transform_indices = @transform_1, window_bounds = array<i64: 256, 256>}, {pipeline_mode = #tpu.pipeline_mode<synchronous>, transform_indices = @transform_2, window_bounds = array<i64: 1, 256>}, {pipeline_mode = #tpu.pipeline_mode<synchronous>, transform_indices = @transform_3, window_bounds = array<i64: 1, 256>}, {pipeline_mode = #tpu.pipeline_mode<synchronous>, transform_indices = @transform_4, window_bounds = array<i64: 16, 256>}]} {
    %c0_i32 = arith.constant 0 : i32
    %0 = arith.cmpi eq, %arg0, %c0_i32 : i32
    %1 = arith.extui %0 : i1 to i32
    %c0_i32_0 = arith.constant 0 : i32
    %2 = arith.cmpi ne, %1, %c0_i32_0 : i32
    scf.if %2 {
      %cst_19 = arith.constant 0.000000e+00 : f32
      %29 = vector.broadcast %cst_19 : f32 to vector<1x256xf32>
      %c0_20 = arith.constant 0 : index
      %c0_21 = arith.constant 0 : index
      %30 = vector.load %arg7[%c0_20, %c0_21] : memref<1x256xf32, #tpu.memory_space<vmem>>, vector<1x256xf32>
      tpu.vector_store %arg7[%c0_20, %c0_21], %29 {strides = array<i32>} : memref<1x256xf32, #tpu.memory_space<vmem>>, vector<1x256xf32>,
      %cst_22 = arith.constant 0.000000e+00 : f32
      %31 = vector.broadcast %cst_22 : f32 to vector<1x256xf32>
      %c0_23 = arith.constant 0 : index
      %c0_24 = arith.constant 0 : index
      %32 = vector.load %arg8[%c0_23, %c0_24] : memref<1x256xf32, #tpu.memory_space<vmem>>, vector<1x256xf32>
      tpu.vector_store %arg8[%c0_23, %c0_24], %31 {strides = array<i32>} : memref<1x256xf32, #tpu.memory_space<vmem>>, vector<1x256xf32>,
    } else {
    }
    %c0 = arith.constant 0 : index
    %c0_1 = arith.constant 0 : index
    %c0_2 = arith.constant 0 : index
    %3 = vector.load %arg1[%c0, %c0_1, %c0_2] : memref<8x16x256xbf16, #tpu.memory_space<vmem>>, vector<8x16x256xbf16>
    %4 = arith.extf %3 : vector<8x16x256xbf16> to vector<8x16x256xf32>
    %cst = arith.constant dense<0.000000e+00> : vector<8x256xf32>
    %5 = vector.multi_reduction <add>, %4, %cst [1] : vector<8x16x256xf32> to vector<8x256xf32>
    %cst_3 = arith.constant 6.250000e-02 : f32
    %6 = vector.broadcast %cst_3 : f32 to vector<8x256xf32>
    %7 = arith.mulf %5, %6 : vector<8x256xf32>
    %8 = arith.truncf %7 : vector<8x256xf32> to vector<8x256xbf16>
    %c0_4 = arith.constant 0 : index
    %c0_5 = arith.constant 0 : index
    %9 = vector.load %arg2[%c0_4, %c0_5] : memref<256x256xbf16, #tpu.memory_space<vmem>>, vector<256x256xbf16>
    %cst_6 = arith.constant dense<0.000000e+00> : vector<8x256xf32>
    %10 = tpu.matmul %8, %9, %cst_6 {dimension_numbers = #tpu.dot_dimension_numbers<[1], [0], [0], [1], [0, 0, 1, 1], [], []>} : vector<8x256xbf16>, vector<256x256xbf16>, vector<8x256xf32> -> vector<8x256xf32>
    %c8_i32 = arith.constant 8 : i32
    %11 = arith.muli %arg0, %c8_i32 : i32
    %12 = tpu.assume_multiple %11, 8 : i32
    %13 = arith.index_cast %12 : i32 to index
    %c0_7 = arith.constant 0 : index
    %14 = vector.load %arg6[%13, %c0_7] : memref<16x256xf32, #tpu.memory_space<vmem>>, vector<8x256xf32>
    tpu.vector_store %arg6[%13, %c0_7], %10 {strides = array<i32>} : memref<16x256xf32, #tpu.memory_space<vmem>>, vector<8x256xf32>,
    %c0_8 = arith.constant 0 : index
    %c0_9 = arith.constant 0 : index
    %15 = vector.load %arg7[%c0_8, %c0_9] : memref<1x256xf32, #tpu.memory_space<vmem>>, vector<1x256xf32>
    %cst_10 = arith.constant dense<0.000000e+00> : vector<256xf32>
    %16 = vector.multi_reduction <add>, %10, %cst_10 [0] : vector<8x256xf32> to vector<256xf32>
    %17 = vector.shape_cast %16 : vector<256xf32> to vector<1x256xf32>
    %18 = arith.addf %15, %17 : vector<1x256xf32>
    %c0_11 = arith.constant 0 : index
    %c0_12 = arith.constant 0 : index
    %19 = vector.load %arg7[%c0_11, %c0_12] : memref<1x256xf32, #tpu.memory_space<vmem>>, vector<1x256xf32>
    tpu.vector_store %arg7[%c0_11, %c0_12], %18 {strides = array<i32>} : memref<1x256xf32, #tpu.memory_space<vmem>>, vector<1x256xf32>,
    %c0_13 = arith.constant 0 : index
    %c0_14 = arith.constant 0 : index
    %20 = vector.load %arg8[%c0_13, %c0_14] : memref<1x256xf32, #tpu.memory_space<vmem>>, vector<1x256xf32>
    %21 = arith.mulf %10, %10 : vector<8x256xf32>
    %cst_15 = arith.constant dense<0.000000e+00> : vector<256xf32>
    %22 = vector.multi_reduction <add>, %21, %cst_15 [0] : vector<8x256xf32> to vector<256xf32>
    %23 = vector.shape_cast %22 : vector<256xf32> to vector<1x256xf32>
    %24 = arith.addf %20, %23 : vector<1x256xf32>
    %c0_16 = arith.constant 0 : index
    %c0_17 = arith.constant 0 : index
    %25 = vector.load %arg8[%c0_16, %c0_17] : memref<1x256xf32, #tpu.memory_space<vmem>>, vector<1x256xf32>
    tpu.vector_store %arg8[%c0_16, %c0_17], %24 {strides = array<i32>} : memref<1x256xf32, #tpu.memory_space<vmem>>, vector<1x256xf32>,
    %c1_i32 = arith.constant 1 : i32
    %26 = arith.cmpi eq, %arg0, %c1_i32 : i32
    %27 = arith.extui %26 : i1 to i32
    %c0_i32_18 = arith.constant 0 : i32
    %28 = arith.cmpi ne, %27, %c0_i32_18 : i32
    scf.if %28 {
      %c0_19 = arith.constant 0 : index
      %c0_20 = arith.constant 0 : index
      %29 = vector.load %arg7[%c0_19, %c0_20] : memref<1x256xf32, #tpu.memory_space<vmem>>, vector<1x256xf32>
      %cst_21 = arith.constant 6.250000e-02 : f32
      %30 = vector.broadcast %cst_21 : f32 to vector<1x256xf32>
      %31 = arith.mulf %29, %30 : vector<1x256xf32>
      %c0_22 = arith.constant 0 : index
      %c0_23 = arith.constant 0 : index
      %32 = vector.load %arg8[%c0_22, %c0_23] : memref<1x256xf32, #tpu.memory_space<vmem>>, vector<1x256xf32>
      %cst_24 = arith.constant 6.250000e-02 : f32
      %33 = vector.broadcast %cst_24 : f32 to vector<1x256xf32>
      %34 = arith.mulf %32, %33 : vector<1x256xf32>
      %35 = arith.mulf %31, %31 : vector<1x256xf32>
      %36 = arith.subf %34, %35 : vector<1x256xf32>
      %cst_25 = arith.constant 0.000000e+00 : f32
      %37 = vector.broadcast %cst_25 : f32 to vector<1x256xf32>
      %38 = arith.maximumf %36, %37 : vector<1x256xf32>
      %cst_26 = arith.constant 9.99999974E-6 : f32
      %39 = vector.broadcast %cst_26 : f32 to vector<1x256xf32>
      %40 = arith.addf %38, %39 : vector<1x256xf32>
      %41 = math.rsqrt %40 : vector<1x256xf32>
      %c0_27 = arith.constant 0 : index
      %c0_28 = arith.constant 0 : index
      %42 = vector.load %arg6[%c0_27, %c0_28] : memref<16x256xf32, #tpu.memory_space<vmem>>, vector<16x256xf32>
      %43 = vector.broadcast %31 : vector<1x256xf32> to vector<16x256xf32>
      %44 = arith.subf %42, %43 : vector<16x256xf32>
      %45 = vector.broadcast %41 : vector<1x256xf32> to vector<16x256xf32>
      %46 = arith.mulf %44, %45 : vector<16x256xf32>
      %c0_29 = arith.constant 0 : index
      %c0_30 = arith.constant 0 : index
      %47 = vector.load %arg3[%c0_29, %c0_30] : memref<1x256xf32, #tpu.memory_space<vmem>>, vector<1x256xf32>
      %48 = vector.broadcast %47 : vector<1x256xf32> to vector<16x256xf32>
      %49 = arith.mulf %46, %48 : vector<16x256xf32>
      %c0_31 = arith.constant 0 : index
      %c0_32 = arith.constant 0 : index
      %50 = vector.load %arg4[%c0_31, %c0_32] : memref<1x256xf32, #tpu.memory_space<vmem>>, vector<1x256xf32>
      %51 = vector.broadcast %50 : vector<1x256xf32> to vector<16x256xf32>
      %52 = arith.addf %49, %51 : vector<16x256xf32>
      %c0_33 = arith.constant 0 : index
      %c0_34 = arith.constant 0 : index
      %53 = vector.load %arg5[%c0_33, %c0_34] : memref<16x256xf32, #tpu.memory_space<vmem>>, vector<16x256xf32>
      tpu.vector_store %arg5[%c0_33, %c0_34], %52 {strides = array<i32>} : memref<16x256xf32, #tpu.memory_space<vmem>>, vector<16x256xf32>,
    } else {
    }
    return
  }
  func.func @transform_0(%arg0: i32) -> (i32, i32, i32) {
    %c0_i32 = arith.constant 0 : i32
    %c0_i32_0 = arith.constant 0 : i32
    %c0_i32_1 = arith.constant 0 : i32
    return %arg0, %c0_i32, %c0_i32_0 : i32, i32, i32
  }
  func.func @transform_1(%arg0: i32) -> (i32, i32) {
    %c0_i32 = arith.constant 0 : i32
    %c0_i32_0 = arith.constant 0 : i32
    %c0_i32_1 = arith.constant 0 : i32
    return %c0_i32, %c0_i32_0 : i32, i32
  }
  func.func @transform_2(%arg0: i32) -> (i32, i32) {
    %c0_i32 = arith.constant 0 : i32
    %c0_i32_0 = arith.constant 0 : i32
    %c0_i32_1 = arith.constant 0 : i32
    return %c0_i32, %c0_i32_0 : i32, i32
  }
  func.func @transform_3(%arg0: i32) -> (i32, i32) {
    %c0_i32 = arith.constant 0 : i32
    %c0_i32_0 = arith.constant 0 : i32
    %c0_i32_1 = arith.constant 0 : i32
    return %c0_i32, %c0_i32_0 : i32, i32
  }
  func.func @transform_4(%arg0: i32) -> (i32, i32) {
    %c0_i32 = arith.constant 0 : i32
    %c0_i32_0 = arith.constant 0 : i32
    %c0_i32_1 = arith.constant 0 : i32
    return %c0_i32, %c0_i32_0 : i32, i32
  }
}

</mosaic_0001>

<bundles_post_ra>
// kernel: tpu_custom_call.1
= control target key start
LH: loop header
LB: loop body
LE: loop exit
PB: predicated region body
PF: predicated region fallthrough
CT: control target
= control target key end

     0   :  { %9 = vsyncpa [#allocation6], 0  ;;  %s1549_s0 = inlined_call_operand.hbm [shape: bf16[16,16,256], index: 0, kind: input, shape index: {}]   ;;  %s1550_s1 = inlined_call_operand.hbm [shape: bf16[256,256], index: 1, kind: input, shape index: {}]   ;;  %s1551_s2 = inlined_call_operand.vmem [shape: f32[1,256], index: 2, kind: input, shape index: {}]   ;;  %s1552_s3 = inlined_call_operand.vmem [shape: f32[1,256], index: 3, kind: input, shape index: {}]   ;;  %s1553_s4 = inlined_call_operand.hbm [shape: f32[16,256], index: 4, kind: output, shape index: {}]  }
   0x1   :  { %11 = vsyncpa [#allocation6 + $0x1], 0 }
   0x2   :  { %12 = vsyncpa [#allocation9], 0 }
   0x3   :  { %13 = vsyncpa [#allocation7], 0  ;;  %s1271_s15 = smov 0   ;;  %s1273_s16 = smov 0  }
   0x4   :  { %s1275_s17 = smov 0   ;;  %s1277_s18 = smov 0  }
   0x5 LB: > { %s1290_s19 = sadd.s32 4294967295, %s1235_s18   ;;  %p39_p0 = scmp.ne.s32.totalorder %s1227_s16, %s1223_s15  ;;  %s1235_s18 = sphi %s1277_s18, %s1573_s18   ;;  %s1231_s17 = sphi %s1275_s17, %s1572_s17   ;;  %s1227_s16 = sphi %s1273_s16, %s1571_s16   ;;  %s1223_s15 = sphi %s1271_s15, %s1570_s15  }
   0x6   : > { %p1554_p1 = scmp.eq.s32.totalorder %s1290_s19, 0  ;;  %p948_p2 = scmp.ge.s32.totalorder %s1235_s18, 1 }
   0x7   : > { %p134_p3 = scmp.lt.s32.totalorder %s1235_s18, 3  ;;  %s1237_s22 = smov [#allocation8]  }
   0x8   : > { %p1299_p5 = por %p1554_p1, %p39_p0  ;;  %s146_s23 = sshll.u32 %s1237_s22, 4  ;;  %s147_s23 = int_to_ptr.vmem [resolvable:$true] %s146_s23 }
   0x9   : > { %p1303_p6 = pnand %p948_p2, %p134_p3  ;;  %s1316_s25 = sadd.s32 1, %s1235_s18  }
   0xa   : > { %s1557_s20 = scalar_select %p1299_p5, 1, 0 }
   0xb   : > { %s1558_s21 = scalar_select %p1303_p6, 1, 0 }
   0xc   : > { %p1012_p7 = pneg %p1303_p6  ;;  %s26_s26 = sadd.s32 1, %s1231_s17 }
   0xd   : > { %s23_s27 = ssub.s32 %s1235_s18, %s1316_s25  ;;  %s1126_s28 = scalar_lea.vmem %s147_s23, 4096 }
   0xe   : > { %p1311_p8 = pnand %p1012_p7, %p1554_p1  ;;  %p1127_p10 = scmp.ne.s32.totalorder %s147_s23, %s1126_s28 }
   0xf   : > { %p1134_p13 = scmp.lt.s32.totalorder %s147_s23, %s147_s23  ;;  %p1135_p0 = scmp.lt.s32.totalorder %s1126_s28, %s1126_s28 }
  0x10   : > { %p1117_p9 = pneg %p1311_p8 }
  0x11   : > { %p1136_p2 = por %p1135_p0, %p1134_p13 }
  0x12   : > { %p1129_p11 = pnand %p1127_p10, %p1117_p9 }
  0x14   : > { %p1130_p12 = pneg %p1129_p11 }
  0x16   : > { %p1137_p3 = pnand %p1136_p2, %p1130_p12 }
  0x18   : > { %1140 = shalt.err (!%p1137_p3)
}
  0x19   : > { %s1238_s29 = smov 128   ;;  %s1239_s30 = smov 8  }
  0x1a   : > { %1015 = dma.hbm_to_vmem [thread:$0]  (!%p1311_p8), %s1550_s1, 4096, %s147_s23, [#allocation9], %s1238_s29, %s1238_s29, %s1239_s30  }
  0x1b   : > { %p24_p7 = scmp.eq.s32.totalorder %s23_s27, 0  ;;  %p33_p9 = scmp.ne.s32.totalorder %s1231_s17, %s1227_s16 }
  0x1c   : > { %p34_p10 = scmp.eq.s32.totalorder %s1235_s18, 0  ;;  %p1021_p11 = scmp.lt.s32.totalorder %s1235_s18, 2 }
  0x1d   : > { %s1336_s7 = scalar_select %p24_p7, %s1231_s17, %s26_s26  }
  0x1e   : > { %p35_p12 = por %p34_p10, %p33_p9  ;;  %s166_s8 = sand.u32 1, %s1231_s17  }
  0x1f   : > { %s951_s9 = sshll.u32 %s166_s8, 7  ;;  %s1000_s10 = sshll.u32 %s1235_s18, 11 }
  0x20   : > { %s1343_s13 = scalar_lea.hbm %s1549_s0, %s1000_s10  ;;  %s170_s14 = scalar_lea.vmem [#allocation5], %s951_s9 }
  0x21   : > { %s178_s15 = sshll.u32 %s170_s14, 4  ;;  %p1347_p8 = pnand %p1021_p11, %p35_p12  ;;  %s1345_s15 = int_to_ptr.vmem [resolvable:$true] %s178_s15 }
  0x22   : > { %s1351_s23 = scalar_lea.sflag [#allocation6], %s166_s8  ;;  %s1141_s18 = scalar_lea.hbm %s1343_s13, 2048 }
  0x23   : > { %p1142_p13 = scmp.ne.s32.totalorder %s1343_s13, %s1141_s18  ;;  %p1143_p0 = pneg %p1347_p8 }
  0x24   : > { %s1146_s27 = scalar_lea.hbm %s1549_s0, 4096  ;;  %p1147_p7 = scmp.lt.s32.totalorder %s1343_s13, %s1549_s0 }
  0x25   : > { %p1144_p2 = pnand %p1143_p0, %p1142_p13  ;;  %p1148_p9 = scmp.lt.s32.totalorder %s1146_s27, %s1141_s18 }
  0x27   : > { %p1145_p3 = pneg %p1144_p2  ;;  %p1149_p10 = por %p1148_p9, %p1147_p7 }
  0x29   : > { %p1150_p11 = pnand %p1149_p10, %p1145_p3 }
  0x2b   : > { %1153 = shalt.err (!%p1150_p11)
}
  0x2c   : > { %s1154_s6 = scalar_lea.vmem %s1345_s15, 2048  ;;  %s1240_s8 = smov [#allocation5]  }
  0x2d   : > { %p1155_p12 = scmp.ne.s32.totalorder %s1345_s15, %s1154_s6  ;;  %s1159_s9 = sshll.u32 %s1240_s8, 4  ;;  %s1160_s9 = int_to_ptr.vmem [resolvable:$false] %s1159_s9 }
  0x2e   : > { %s1161_s10 = scalar_lea.vmem %s1160_s9, 4096  ;;  %p1162_p2 = scmp.lt.s32.totalorder %s1345_s15, %s1160_s9 }
  0x2f   : > { %p1157_p4 = pnand %p1155_p12, %p1143_p0  ;;  %p1163_p1 = scmp.lt.s32.totalorder %s1161_s10, %s1154_s6 }
  0x31   : > { %p1158_p13 = pneg %p1157_p4  ;;  %p1164_p5 = por %p1163_p1, %p1162_p2 }
  0x33   : > { %p1165_p6 = pnand %p1164_p5, %p1158_p13 }
  0x35   : > { %1168 = shalt.err (!%p1165_p6)
}
  0x36   : > { %1019 = dma.hbm_to_vmem [thread:$0]  (!%p1347_p8), %s1343_s13, 2048, %s1345_s15, %s1351_s23, %s1238_s29, %s1238_s29, %s1239_s30  }
  0x37   : > { %p1561_p4 = scmp.ne.s32.totalorder %s1558_s21, 0 }
  0x38   : > { %s192_s11 = sand.u32 (!%p1561_p4), 1, %s1227_s16   ;;  %p1562_p1 = scmp.ne.s32.totalorder (!%p1561_p4), %s1557_s20, 0 }
  0x39   : > { %190 = sbr.rel (%p1561_p4) target bundleno = 423 (0x1a7), region = 36  ;;  %s956_s12 = sshll.u32 (!%p1561_p4), %s192_s11, 7 }
  0x3a   : > { %s193_s14 = scalar_lea.sflag (!%p1561_p4), [#allocation6], %s192_s11  ;;  %s1378_s18 = scalar_lea.vmem (!%p1561_p4), [#allocation5], %s956_s12 }
  0x3e   : > { %1210 = dma.done.wait (%p1562_p1), %s193_s14, 2048  }
  0x3f   : > { %1212 = vsyncadd (%p1562_p1), %s193_s14, 4294965248  ;;  %p1563_p5 = scmp.eq.s32.totalorder %s1290_s19, 0 }
  0x41   : > { %1214 = dma.done.wait (%p1563_p5), [#allocation9], 4096   ;;  %p1564_p6 = pmov %p1563_p5 }
  0x42   : > { %p1565_p8 = scmp.ne.s32.totalorder %s1290_s19, 0 }
  0x43   : > { %1216 = vsyncadd (%p1564_p6), [#allocation9], 4294963200 }
  0x44   : > { %224 = sbr.rel (%p1565_p8) target bundleno = 77 (0x4d), region = 48 }
  0x49   : > { %v225_v0 = vlaneseq  ;;  %v1241_v1 = vmov 0.0  }
  0x4b   : > { %vm227_vm0 = vcmp.lt.s32.totalorder %v225_v0, 256 }
  0x4c   : > { %229 = vst.msk [vmem:[#allocation3] sm:$0x3] %vm227_vm0, %v1241_v1  ;;  %230 = vst.msk [vmem:[#allocation4] sm:$0x3] %vm227_vm0, %v1241_v1 }
  0x4d PF: > { %v1065_v2 = vld [vmem:[#allocation8 + $0x74] ss:$8 sps:$4 sm:$0xff]   ;;  %v1067_v3 = vld [vmem:[#allocation8 + $0x70] ss:$8 sps:$4 sm:$0xff]   ;;  %v1068_v4 = vld [vmem:[#allocation8 + $0x64] ss:$8 sps:$4 sm:$0xff]  }
  0x4e   : > { %672 = vmatprep.subr.bf16.mxu0 %v1065_v2  ;;  %v1070_v5 = vld [vmem:[#allocation8 + $0x60] ss:$8 sps:$4 sm:$0xff]   ;;  %v1071_v6 = vld [vmem:[#allocation8 + $0x54] ss:$8 sps:$4 sm:$0xff]   ;;  %v1073_v7 = vld [vmem:[#allocation8 + $0x50] ss:$8 sps:$4 sm:$0xff]  }
  0x4f   : > { %673 = vmatpush1.bf16.msra.mxu0 %v1067_v3  ;;  %v1074_v8 = vld [vmem:[#allocation8 + $0x44] ss:$8 sps:$4 sm:$0xff]   ;;  %v1076_v9 = vld [vmem:[#allocation8 + $0x40] ss:$8 sps:$4 sm:$0xff]   ;;  %v1077_v10 = vld [vmem:[#allocation8 + $0x34] ss:$8 sps:$4 sm:$0xff]  }
  0x50   : > { %674 = vmatprep.subr.bf16.mxu0 %v1068_v4  ;;  %v1079_v11 = vld [vmem:[#allocation8 + $0x30] ss:$8 sps:$4 sm:$0xff]   ;;  %v1080_v12 = vld [vmem:[#allocation8 + $0x24] ss:$8 sps:$4 sm:$0xff]   ;;  %v1082_v13 = vld [vmem:[#allocation8 + $0x20] ss:$8 sps:$4 sm:$0xff]  }
  0x51   : > { %v1083_v14 = vld [vmem:[#allocation8 + $0x14] ss:$8 sps:$4 sm:$0xff]   ;;  %v1085_v15 = vld [vmem:[#allocation8 + $0x10] ss:$8 sps:$4 sm:$0xff]   ;;  %v1391_v16 = vld [vmem:[%s1378_s18] sm:$0xff]  ;;  %vm487_vm1 = vcmask 1041409  }
  0x52   : > { %v1394_v17 = vld [vmem:[%s1378_s18 + $0x8] sm:$0xff]  ;;  %v1397_v19 = vld [vmem:[%s1378_s18 + $0x10] sm:$0xff]  ;;  %v1400_v20 = vld [vmem:[%s1378_s18 + $0x18] sm:$0xff]  ;;  %v247_v22 = vunpack.c.l.bf16 %v1391_v16  ;;  %v248_v23 = vunpack.c.h.bf16 %v1391_v16  ;;  %vm489_vm2 = vcmask 1042434   ;;  %vm491_vm3 = vcmask 1043459   ;;  %s991_s20 = sshll.u32 %s1290_s19, 3 }
  0x53   : > { %675 = vmatpush1.bf16.msra.mxu0 %v1070_v5  ;;  %v1086_v18 = vld [vmem:[#allocation8 + $0x4] ss:$8 sps:$4 sm:$0xff]   ;;  %v249_v24 = vunpack.c.l.bf16 %v1394_v17  ;;  %v250_v25 = vunpack.c.h.bf16 %v1394_v17  ;;  %v1413_v27 = vld [vmem:[%s1378_s18 + $0x30] sm:$0xff]  ;;  %v1416_v28 = vld [vmem:[%s1378_s18 + $0x38] sm:$0xff]  ;;  %v251_v29 = vunpack.c.l.bf16 %v1397_v19  ;;  %v252_v30 = vunpack.c.h.bf16 %v1397_v19  ;;  %s714_s21 = sshra.s32 %s991_s20, 3  ;;  %p994_p0 = scmp.ne.s32.totalorder %s1290_s19, 1 }
  0x54   : > { %676 = vmatprep.subr.bf16.mxu0 %v1071_v6  ;;  %v1403_v21 = vld [vmem:[%s1378_s18 + $0x20] sm:$0xff]  ;;  %v1410_v26 = vld [vmem:[%s1378_s18 + $0x28] sm:$0xff]  ;;  %v253_v31 = vunpack.c.l.bf16 %v1400_v20  ;;  %v254_v32 = vunpack.c.h.bf16 %v1400_v20  ;;  %v1429_v35 = vld [vmem:[%s1378_s18 + $0x50] sm:$0xff]  ;;  %v259_v43 = vunpack.c.l.bf16 %v1413_v27  ;;  %v260_v44 = vunpack.c.h.bf16 %v1413_v27  ;;  %s1001_s29 = sshll.u32 %s714_s21, 4 }
  0x55   : > { %v1423_v33 = vld [vmem:[%s1378_s18 + $0x40] sm:$0xff]  ;;  %v1426_v34 = vld [vmem:[%s1378_s18 + $0x48] sm:$0xff]  ;;  %v255_v36 = vunpack.c.l.bf16 %v1403_v21  ;;  %v256_v37 = vunpack.c.h.bf16 %v1403_v21  ;;  %v257_v38 = vunpack.c.l.bf16 %v1410_v26  ;;  %v258_v39 = vunpack.c.h.bf16 %v1410_v26  ;;  %v1436_v40 = vld [vmem:[%s1378_s18 + $0x58] sm:$0xff]  ;;  %s718_s30 = scalar_lea.vmem [#allocation2], %s1001_s29 }
  0x56   : > { %v1439_v41 = vld [vmem:[%s1378_s18 + $0x60] sm:$0xff]  ;;  %v1442_v42 = vld [vmem:[%s1378_s18 + $0x68] sm:$0xff]  ;;  %v261_v45 = vunpack.c.l.bf16 %v1416_v28  ;;  %v262_v46 = vunpack.c.h.bf16 %v1416_v28  ;;  %v1449_v47 = vld [vmem:[%s1378_s18 + $0x70] sm:$0xff]  ;;  %v263_v49 = vunpack.c.l.bf16 %v1423_v33  ;;  %v264_v50 = vunpack.c.h.bf16 %v1423_v33 }
  0x57   : > { %677 = vmatpush1.bf16.msra.mxu0 %v1073_v7  ;;  %v1452_v48 = vld [vmem:[%s1378_s18 + $0x78] sm:$0xff]  ;;  %v265_v51 = vunpack.c.l.bf16 %v1426_v34  ;;  %v266_v52 = vunpack.c.h.bf16 %v1426_v34  ;;  %v1088_v53 = vld [vmem:[#allocation8] ss:$8 sps:$4 sm:$0xff]   ;;  %v267_v54 = vunpack.c.l.bf16 %v1429_v35  ;;  %v268_v55 = vunpack.c.h.bf16 %v1429_v35 }
  0x58   : > { %678 = vmatprep.subr.bf16.mxu0 %v1074_v8  ;;  %v269_v56 = vunpack.c.l.bf16 %v1436_v40  ;;  %v270_v57 = vunpack.c.h.bf16 %v1436_v40  ;;  %v1089_v58 = vld [vmem:[#allocation8 + $0xf4] ss:$8 sps:$4 sm:$0xff]   ;;  %v272_v60 = vunpack.c.h.bf16 %v1439_v41  ;;  %v274_v62 = vunpack.c.h.bf16 %v1442_v42  ;;  %v1091_v7 = vld [vmem:[#allocation8 + $0xf0] ss:$8 sps:$4 sm:$0xff]  }
  0x59   : > { %v276_v0 = vunpack.c.h.bf16 %v1449_v47  ;;  %v278_v2 = vunpack.c.h.bf16 %v1452_v48  ;;  %v286_v3 = vadd.f32 %v250_v25, %v248_v23  ;;  %v300_v4 = vadd.f32 %v254_v32, %v252_v30  ;;  %v1107_v20 = vld [vmem:[#allocation8 + $0x94] ss:$8 sps:$4 sm:$0xff]  }
  0x5a   : > { %v314_v5 = vadd.f32 %v258_v39, %v256_v37  ;;  %v328_v6 = vadd.f32 %v262_v46, %v260_v44  ;;  %v342_v8 = vadd.f32 %v266_v52, %v264_v50  ;;  %v1094_v37 = vld [vmem:[#allocation8 + $0xe0] ss:$8 sps:$4 sm:$0xff]   ;;  %v1095_v52 = vld [vmem:[#allocation8 + $0xd4] ss:$8 sps:$4 sm:$0xff]   ;;  %vm493_vm4 = vcmask 1044484  }
  0x5b   : > { %679 = vmatpush1.bf16.msra.mxu0 %v1076_v9  ;;  %v356_v9 = vadd.f32 %v270_v57, %v268_v55  ;;  %vm495_vm5 = vcmask 1045509   ;;  %vm497_vm6 = vcmask 1046534   ;;  %vm499_vm7 = vcmask 1047559  }
  0x5c   : > { %680 = vmatprep.subr.bf16.mxu0 %v1077_v10  ;;  %v370_v10 = vadd.f32 %v274_v62, %v272_v60  ;;  %v343_v63 = vrot.slane %v342_v8, 4  ;;  %v321_v16 = vadd.f32 %v261_v45, %v259_v43  ;;  %v335_v17 = vadd.f32 %v265_v51, %v263_v49  ;;  %v1110_v51 = vld [vmem:[#allocation8 + $0x84] ss:$8 sps:$4 sm:$0xff]  }
  0x5d   : > { %v357_v1 = vrot.slane %v356_v9, 4  ;;  %v349_v19 = vadd.f32 %v269_v56, %v267_v54 }
  0x5e   : > { %v371_v61 = vrot.slane %v370_v10, 4  ;;  %v344_v39 = vadd.f32 %v343_v63, %v342_v8  ;;  %v1098_v8 = vld [vmem:[#allocation8 + $0xc4] ss:$8 sps:$4 sm:$0xff]   ;;  %v322_v28 = vrot.slane %v321_v16, 4 }
  0x5f   : > { %681 = vmatpush1.bf16.msra.mxu0 %v1079_v11  ;;  %v384_v11 = vadd.f32 %v278_v2, %v276_v0  ;;  %v358_v44 = vadd.f32 %v357_v1, %v356_v9 }
  0x60   : > { %682 = vmatprep.subr.bf16.mxu0 %v1080_v12  ;;  %v1092_v12 = vld [vmem:[#allocation8 + $0xe4] ss:$8 sps:$4 sm:$0xff]   ;;  %v372_v46 = vadd.f32 %v371_v61, %v370_v10  ;;  %v345_v60 = vrot.slane %v344_v39, 2  ;;  %v323_v43 = vadd.f32 %v322_v28, %v321_v16 }
  0x61   : > { %v385_v59 = vrot.slane %v384_v11, 4  ;;  %v359_v62 = vrot.slane %v358_v44, 2 }
  0x62   : > { %v373_v0 = vrot.slane %v372_v46, 2  ;;  %v346_v63 = vadd.f32 %v345_v60, %v344_v39 }
  0x63   : > { %683 = vmatpush1.bf16.msra.mxu0 %v1082_v13  ;;  %v287_v13 = vrot.slane %v286_v3, 4  ;;  %v386_v50 = vadd.f32 %v385_v59, %v384_v11  ;;  %v360_v1 = vadd.f32 %v359_v62, %v358_v44 }
  0x64   : > { %684 = vmatprep.subr.bf16.mxu0 %v1083_v14  ;;  %v301_v14 = vrot.slane %v300_v4, 4  ;;  %v374_v61 = vadd.f32 %v373_v0, %v372_v46 }
  0x65   : > { %v288_v23 = vadd.f32 %v287_v13, %v286_v3  ;;  %v387_v2 = vrot.slane %v386_v50, 2  ;;  %v347_v13 = vrot.slane %v346_v63, 1 }
  0x66   : > { %v302_v25 = vadd.f32 %v301_v14, %v300_v4  ;;  %v361_v14 = vrot.slane %v360_v1, 1 }
  0x67   : > { %685 = vmatpush1.bf16.msra.mxu0 %v1085_v15  ;;  %v315_v15 = vrot.slane %v314_v5, 4  ;;  %v388_v59 = vadd.f32 %v387_v2, %v386_v50  ;;  %v348_v39 = vadd.f32 %v347_v13, %v346_v63 }
  0x68   : > { %686 = vmatprep.subr.bf16.mxu0 %v1086_v18  ;;  %v329_v18 = vrot.slane %v328_v6, 4  ;;  %v303_v55 = vrot.slane %v302_v25, 2  ;;  %v362_v44 = vadd.f32 %v361_v14, %v360_v1 }
  0x69   : > { %v316_v30 = vadd.f32 %v315_v15, %v314_v5  ;;  %v375_v15 = vrot.slane %v374_v61, 1  ;;  %v400_v60 = vmul.f32 0.0625, %v348_v39 }
  0x6a   : > { %v330_v32 = vadd.f32 %v329_v18, %v328_v6  ;;  %v304_v4 = vadd.f32 %v303_v55, %v302_v25  ;;  %v389_v18 = vrot.slane %v388_v59, 1  ;;  %v402_v62 = vmul.f32 0.0625, %v362_v44 }
  0x6b   : > { %687 = vmatpush1.bf16.msra.mxu0 %v1088_v53  ;;  %v289_v53 = vrot.slane %v288_v23, 2  ;;  %v317_v57 = vrot.slane %v316_v30, 2  ;;  %v376_v46 = vadd.f32 %v375_v15, %v374_v61  ;;  %v416_v63 = vpack.c.bf16 %v400_v60, %v400_v60 }
  0x6c   : > { %688 = vmatprep.subr.bf16.mxu0 %v1089_v58  ;;  %v331_v58 = vrot.slane %v330_v32, 2  ;;  %v305_v10 = vrot.slane %v304_v4, 1  ;;  %v390_v50 = vadd.f32 %v389_v18, %v388_v59  ;;  %v418_v1 = vpack.c.bf16 %v402_v62, %v402_v62 }
  0x6d   : > { %v290_v3 = vadd.f32 %v289_v53, %v288_v23  ;;  %v318_v5 = vadd.f32 %v317_v57, %v316_v30  ;;  %v404_v0 = vmul.f32 0.0625, %v376_v46  ;;  %v480_v13 = vunpack.c.l.b16 %v416_v63 }
  0x6e   : > { %v332_v6 = vadd.f32 %v331_v58, %v330_v32  ;;  %v306_v25 = vadd.f32 %v305_v10, %v304_v4  ;;  %v406_v2 = vmul.f32 0.0625, %v390_v50  ;;  %v482_v14 = vunpack.c.l.b16 %v418_v1 }
  0x6f   : > { %689 = vmatpush2.bf16.msra.mxu0 %v1091_v7  ;;  %v1097_v7 = vld [vmem:[#allocation8 + $0xd0] ss:$8 sps:$4 sm:$0xff]   ;;  %v291_v9 = vrot.slane %v290_v3, 1  ;;  %v319_v11 = vrot.slane %v318_v5, 1  ;;  %v420_v61 = vpack.c.bf16 %v404_v0, %v404_v0  ;;  %v1566_v62 = vunpack.c.l.bf16 %v1439_v41 }
  0x70   : > { %690 = vmatprep.subr.bf16.mxu0 %v1092_v12  ;;  %v333_v12 = vrot.slane %v332_v6, 1  ;;  %v394_v55 = vmul.f32 0.0625, %v306_v25  ;;  %v422_v59 = vpack.c.bf16 %v406_v2, %v406_v2  ;;  %v279_v25 = vadd.f32 %v249_v24, %v247_v22 }
  0x71   : > { %v292_v23 = vadd.f32 %v291_v9, %v290_v3  ;;  %v320_v30 = vadd.f32 %v319_v11, %v318_v5  ;;  %v484_v15 = vunpack.c.l.b16 %v420_v61  ;;  %v1567_v0 = vunpack.c.l.bf16 %v1442_v42 }
  0x72   : > { %v334_v32 = vadd.f32 %v333_v12, %v332_v6  ;;  %v410_v4 = vpack.c.bf16 %v394_v55, %v394_v55  ;;  %v486_v18 = vunpack.c.l.b16 %v422_v59  ;;  %v280_v22 = vrot.slane %v279_v25, 4 }
  0x73   : > { %691 = vmatpush2.bf16.msra.mxu0 %v1094_v37  ;;  %v1100_v37 = vld [vmem:[#allocation8 + $0xc0] ss:$8 sps:$4 sm:$0xff]   ;;  %v392_v53 = vmul.f32 0.0625, %v292_v23  ;;  %v396_v57 = vmul.f32 0.0625, %v320_v30  ;;  %v293_v30 = vadd.f32 %v253_v31, %v251_v29  ;;  %v336_v29 = vrot.slane %v335_v17, 4 }
  0x74   : > { %692 = vmatprep.subr.bf16.mxu0 %v1095_v52  ;;  %v1101_v52 = vld [vmem:[#allocation8 + $0xb4] ss:$8 sps:$4 sm:$0xff]   ;;  %v398_v58 = vmul.f32 0.0625, %v334_v32  ;;  %v474_v10 = vunpack.c.l.b16 %v410_v4  ;;  %v307_v32 = vadd.f32 %v257_v38, %v255_v36  ;;  %v350_v31 = vrot.slane %v349_v19, 4  ;;  %v1109_v38 = vld [vmem:[#allocation8 + $0x90] ss:$8 sps:$4 sm:$0xff]  }
  0x75   : > { %v408_v3 = vpack.c.bf16 %v392_v53, %v392_v53  ;;  %v412_v5 = vpack.c.bf16 %v396_v57, %v396_v57  ;;  %v294_v24 = vrot.slane %v293_v30, 4  ;;  %v281_v34 = vadd.f32 %v280_v22, %v279_v25 }
  0x76   : > { %v414_v6 = vpack.c.bf16 %v398_v58, %v398_v58  ;;  %v308_v26 = vrot.slane %v307_v32, 4  ;;  %v337_v45 = vadd.f32 %v336_v29, %v335_v17  ;;  %v351_v49 = vadd.f32 %v350_v31, %v349_v19 }
  0x77   : > { %693 = vmatpush2.bf16.msra.mxu0 %v1097_v7  ;;  %v1103_v7 = vld [vmem:[#allocation8 + $0xb0] ss:$8 sps:$4 sm:$0xff]   ;;  %v472_v9 = vunpack.c.l.b16 %v408_v3  ;;  %v476_v11 = vunpack.c.l.b16 %v412_v5  ;;  %v295_v36 = vadd.f32 %v294_v24, %v293_v30  ;;  %v282_v56 = vrot.slane %v281_v34, 2  ;;  %v1112_v3 = vld [vmem:[#allocation8 + $0x80] ss:$8 sps:$4 sm:$0xff]  }
  0x78   : > { %694 = vmatprep.subr.bf16.mxu0 %v1098_v8  ;;  %v1104_v8 = vld [vmem:[#allocation8 + $0xa4] ss:$8 sps:$4 sm:$0xff]   ;;  %v478_v12 = vunpack.c.l.b16 %v414_v6  ;;  %v309_v35 = vadd.f32 %v308_v26, %v307_v32  ;;  %v338_v53 = vrot.slane %v337_v45, 2  ;;  %v352_v55 = vrot.slane %v351_v49, 2 }
  0x79   : > { %v501_v23 = vsel %vm487_vm1, %v474_v10, %v472_v9  ;;  %v296_v44 = vrot.slane %v295_v36, 2  ;;  %v283_v57 = vadd.f32 %v282_v56, %v281_v34  ;;  %v363_v2 = vadd.f32 %v1567_v0, %v1566_v62 }
  0x7a   : > { %v502_v39 = vsel %vm489_vm2, %v476_v11, %v501_v23  ;;  %v310_v46 = vrot.slane %v309_v35, 2  ;;  %v339_v5 = vadd.f32 %v338_v53, %v337_v45  ;;  %v353_v6 = vadd.f32 %v352_v55, %v351_v49 }
  0x7b   : > { %695 = vmatpush2.bf16.msra.mxu0 %v1100_v37  ;;  %v1106_v37 = vld [vmem:[#allocation8 + $0xa0] ss:$8 sps:$4 sm:$0xff]   ;;  %v503_v21 = vsel %vm491_vm3, %v478_v12, %v502_v39  ;;  %v297_v58 = vadd.f32 %v296_v44, %v295_v36  ;;  %v364_v61 = vrot.slane %v363_v2, 4  ;;  %v1568_v10 = vunpack.c.l.bf16 %v1449_v47 }
  0x7c   : > { %696 = vmatprep.subr.bf16.mxu0 %v1101_v52  ;;  %v504_v27 = vsel %vm493_vm4, %v480_v13, %v503_v21  ;;  %v324_v52 = vrot.slane %v323_v43, 2  ;;  %v311_v60 = vadd.f32 %v310_v46, %v309_v35  ;;  %v354_v9 = vrot.slane %v353_v6, 1 }
  0x7d   : > { %v505_v33 = vsel %vm495_vm5, %v482_v14, %v504_v27  ;;  %v298_v63 = vrot.slane %v297_v58, 1  ;;  %v1569_v41 = vunpack.c.l.bf16 %v1452_v48  ;;  %v365_v14 = vadd.f32 %v364_v61, %v363_v2 }
  0x7e   : > { %v506_v40 = vsel %vm497_vm6, %v484_v15, %v505_v33  ;;  %v325_v4 = vadd.f32 %v324_v52, %v323_v43  ;;  %v312_v1 = vrot.slane %v311_v60, 1  ;;  %v355_v23 = vadd.f32 %v354_v9, %v353_v6 }
  0x7f   : > { %697 = vmatpush2.bf16.msra.mxu0 %v1103_v7  ;;  %v507_v54 = vsel %vm499_vm7, %v486_v18, %v506_v40  ;;  %v284_v7 = vrot.slane %v283_v57, 1  ;;  %v377_v42 = vadd.f32 %v1569_v41, %v1568_v10  ;;  %v299_v12 = vadd.f32 %v298_v63, %v297_v58 }
  0x80   : > { %698 = vmatprep.subr.bf16.mxu0 %v1104_v8  ;;  %v509_v50 = vpack.c.b16 %v507_v54, %v507_v54  ;;  %v326_v59 = vrot.slane %v325_v4, 1  ;;  %v340_v8 = vrot.slane %v339_v5, 1  ;;  %v313_v13 = vadd.f32 %v312_v1, %v311_v60 }
  0x81   : > { %v285_v11 = vadd.f32 %v284_v7, %v283_v57  ;;  %v378_v25 = vrot.slane %v377_v42, 4  ;;  %v366_v30 = vrot.slane %v365_v14, 2  ;;  %v401_v47 = vmul.f32 0.0625, %v355_v23 }
  0x82   : > { %704 = vmatprep.mubr.bf16.mxu0 %v509_v50  ;;  %v327_v15 = vadd.f32 %v326_v59, %v325_v4  ;;  %v341_v18 = vadd.f32 %v340_v8, %v339_v5  ;;  %v395_v39 = vmul.f32 0.0625, %v313_v13  ;;  %v1242_v61 = vmov 1966171168  }
  0x83   : > { %699 = vmatpush2.bf16.msra.mxu0 %v1106_v37  ;;  %v391_v32 = vmul.f32 0.0625, %v285_v11  ;;  %v393_v37 = vmul.f32 0.0625, %v299_v12  ;;  %v379_v16 = vadd.f32 %v378_v25, %v377_v42  ;;  %v417_v28 = vpack.c.bf16 %v401_v47, %v401_v47 }
  0x84   : > { %700 = vmatprep.subr.bf16.mxu0 %v1107_v20  ;;  %v397_v17 = vmul.f32 0.0625, %v327_v15  ;;  %v399_v19 = vmul.f32 0.0625, %v341_v18  ;;  %v367_v20 = vadd.f32 %v366_v30, %v365_v14  ;;  %v411_v22 = vpack.c.bf16 %v395_v39, %v395_v39 }
  0x85   : > { %v407_v48 = vpack.c.bf16 %v391_v32, %v391_v32  ;;  %v409_v21 = vpack.c.bf16 %v393_v37, %v393_v37  ;;  %v380_v24 = vrot.slane %v379_v16, 2  ;;  %v481_v49 = vunpack.c.l.b16 %v417_v28 }
  0x86   : > { %v413_v26 = vpack.c.bf16 %v397_v17, %v397_v17  ;;  %v415_v27 = vpack.c.bf16 %v399_v19, %v399_v19  ;;  %v368_v29 = vrot.slane %v367_v20, 1  ;;  %v475_v34 = vunpack.c.l.b16 %v411_v22 }
  0x87   : > { %701 = vmatpush2.bf16.msra.mxu0 %v1109_v38  ;;  %v471_v31 = vunpack.c.l.b16 %v407_v48  ;;  %v473_v33 = vunpack.c.l.b16 %v409_v21  ;;  %v381_v36 = vadd.f32 %v380_v24, %v379_v16  ;;  %v738_v59 = vunpack.c.l.s4 %v1242_v61 }
  0x88   : > { %702 = vmatprep.subr.bf16.mxu0 %v1110_v51  ;;  %v477_v35 = vunpack.c.l.b16 %v413_v26  ;;  %v479_v38 = vunpack.c.l.b16 %v415_v27  ;;  %v369_v40 = vadd.f32 %v368_v29, %v367_v20  ;;  %v740_v8 = vlaneseq  ;;  %v721_v29 = vld [vmem:[#allocation3] sm:$0x3] }
  0x89   : > { %v488_v43 = vsel %vm487_vm1, %v473_v33, %v471_v31  ;;  %v382_v45 = vrot.slane %v381_v36, 1  ;;  %v739_v23 = vunpack.c.0.s8 %v738_v59 }
  0x8a   : > { %v490_v51 = vsel %vm489_vm2, %v475_v34, %v488_v43  ;;  %v403_v54 = vmul.f32 0.0625, %v369_v40  ;;  %v741_v25 = vshrl.u32 %v740_v8, 7  ;;  %vm755_vm8 = vcmp.lt.s32.totalorder %v740_v8, 256  ;;  %v758_v34 = vld [vmem:[#allocation4] sm:$0x3] }
  0x8b   : > { %703 = vmatpush2.bf16.msra.mxu0 %v1112_v3  ;;  %v492_v56 = vsel %vm491_vm3, %v477_v35, %v490_v51  ;;  %v383_v44 = vadd.f32 %v382_v45, %v381_v36 }
  0x8c   : > { %v494_v46 = vsel %vm493_vm4, %v479_v38, %v492_v56  ;;  %v419_v50 = vpack.c.bf16 %v403_v54, %v403_v54  ;;  %v742_v48 = vsub.s32 %v739_v23, %v741_v25 }
  0x8d   : > { %v405_v52 = vmul.f32 0.0625, %v383_v44  ;;  %v496_v53 = vsel %vm495_vm5, %v481_v49, %v494_v46 }
  0x8e   : > { %v483_v55 = vunpack.c.l.b16 %v419_v50 }
  0x8f   : > { %v421_v57 = vpack.c.bf16 %v405_v52, %v405_v52 }
  0x90   : > { %v498_v58 = vsel %vm497_vm6, %v483_v55, %v496_v53 }
  0x91   : > { %v485_v60 = vunpack.c.l.b16 %v421_v57 }
  0x93   : > { %v500_v62 = vsel %vm499_vm7, %v485_v60, %v498_v58 }
  0x94   : > { %v508_v0 = vpack.c.b16 %v500_v62, %v500_v62 }
  0x96   : > { %705 = vmatmul.mubr.bf16.vlgmr.msra.gmra.mxu0 %v508_v0 }
 0x156   : > { %v706_v2 = vpop.f32.mrf.mxu0 }
 0x157   : > { %719 = vst [vmem:[%s718_s30] sm:$0xff] %v706_v2  ;;  %v722_v3 = vrot.slane %v706_v2, 4  ;;  %v759_v4 = vmul.f32 %v706_v2, %v706_v2 }
 0x158   : > { %v708_v5 = vpop.f32.mrf.mxu0 }
 0x159   : > { %v723_v6 = vadd.f32 %v722_v3, %v706_v2  ;;  %v761_v7 = vrot.slane %v759_v4, 4  ;;  %720 = vst [vmem:[%s718_s30 + $0x8] sm:$0xff] %v708_v5  ;;  %v728_v63 = vrot.slane %v708_v5, 4  ;;  %v760_v1 = vmul.f32 %v708_v5, %v708_v5 }
 0x15a   : > { %v710_v9 = vpop.f32.mrf.mxu0 }
 0x15b   : > { %v724_v10 = vrot.slane %v723_v6, 2  ;;  %v762_v41 = vadd.f32 %v761_v7, %v759_v4  ;;  %v729_v42 = vadd.f32 %v728_v63, %v708_v5  ;;  %v767_v11 = vrot.slane %v760_v1, 4 }
 0x15c   : > { %v711_v12 = vpop.f32.mrf.mxu0 }
 0x15d   : > { %v725_v13 = vadd.f32 %v724_v10, %v723_v6  ;;  %v763_v14 = vrot.slane %v762_v41, 2  ;;  %v730_v15 = vrot.slane %v729_v42, 2  ;;  %v768_v18 = vadd.f32 %v767_v11, %v760_v1 }
 0x15f   : > { %v726_v30 = vrot.slane %v725_v13, 1  ;;  %v764_v32 = vadd.f32 %v763_v14, %v762_v41  ;;  %v731_v37 = vadd.f32 %v730_v15, %v729_v42  ;;  %v769_v39 = vrot.slane %v768_v18, 2 }
 0x161   : > { %v765_v16 = vrot.slane %v764_v32, 1  ;;  %v732_v17 = vrot.slane %v731_v37, 1  ;;  %v770_v19 = vadd.f32 %v769_v39, %v768_v18  ;;  %v727_v47 = vadd.f32 %v726_v30, %v725_v13 }
 0x163   : > { %v733_v20 = vadd.f32 %v732_v17, %v731_v37  ;;  %v771_v21 = vrot.slane %v770_v19, 1  ;;  %v766_v22 = vadd.f32 %v765_v16, %v764_v32 }
 0x165   : > { %v736_v24 = vcombine.low %v727_v47, %v733_v20  ;;  %v772_v26 = vadd.f32 %v771_v21, %v770_v19 }
 0x167   : > { %v743_v27 = vrot.slane %v736_v24, %v742_v48  ;;  %v775_v28 = vcombine.low %v766_v22, %v772_v26 }
 0x169   : > { %v750_v31 = vrot.slane %v743_v27, %v742_v48  ;;  %v782_v33 = vrot.slane %v775_v28, %v742_v48 }
 0x16b   : > { %v752_v36 = vadd.f32 %v750_v31, %v721_v29  ;;  %v789_v35 = vrot.slane %v782_v33, %v742_v48  ;;  %796 = sbr.rel (%p994_p0) target bundleno = 407 (0x197), region = 52 }
 0x16d   : > { %757 = vst.msk [vmem:[#allocation3] sm:$0x3] %vm755_vm8, %v752_v36  ;;  %v791_v38 = vadd.f32 %v789_v35, %v758_v34 }
 0x16f   : > { %792 = vst.msk [vmem:[#allocation4] sm:$0x3] %vm755_vm8, %v791_v38 }
 0x170   : > { %v813_v46 = vsub.s32 0, %v741_v25  ;;  %v817_v50 = vsub.s32 1, %v741_v25  ;;  %v806_v52 = vld [vmem:[#allocation2] sm:$0xff]  ;;  %v807_v57 = vld [vmem:[#allocation2 + $0x8] sm:$0xff]  ;;  %v808_v58 = vld [vmem:[#allocation2 + $0x10] sm:$0xff] }
 0x171   : > { %v809_v60 = vld [vmem:[#allocation2 + $0x18] sm:$0xff]  ;;  %v840_v62 = vld [vmem:[%s1551_s2] sm:$0x3] }
 0x172   : > { %v856_v2 = vld [vmem:[%s1552_s3] sm:$0x3]  ;;  %v845_v63 = vrot.slane %v840_v62, %v813_v46  ;;  %v849_v61 = vrot.slane %v840_v62, %v817_v50 }
 0x173   : > { %v861_v59 = vrot.slane %v856_v2, %v813_v46  ;;  %v865_v8 = vrot.slane %v856_v2, %v817_v50 }
 0x174   : > { %v797_v40 = vld [vmem:[#allocation3] sm:$0x3] }
 0x175   : > { %v798_v45 = vmul.f32 0.0625, %v797_v40 }
 0x176   : > { %v799_v43 = vld [vmem:[#allocation4] sm:$0x3] }
 0x177   : > { %v800_v49 = vmul.f32 0.0625, %v799_v43  ;;  %v801_v51 = vmul.f32 %v798_v45, %v798_v45  ;;  %v814_v53 = vrot.slane %v798_v45, %v813_v46  ;;  %v818_v55 = vrot.slane %v798_v45, %v817_v50 }
 0x179   : > { %v802_v54 = vsub.f32 %v800_v49, %v801_v51  ;;  %v821_v0 = vsub.f32 %v806_v52, %v814_v53  ;;  %v822_v3 = vsub.f32 %v807_v57, %v818_v55  ;;  %v823_v4 = vsub.f32 %v808_v58, %v814_v53 }
 0x17a   : > { %v824_v5 = vsub.f32 %v809_v60, %v818_v55 }
 0x17b   : > { %v803_v56 = vmax.f32 %v802_v54, 0.0 }
 0x17d   : > { %v804_v44 = vadd.f32 1e-05, %v803_v56 }
 0x17f   : > { %1113 = vrsqrt.f32 %v804_v44 }
 0x18c   : > { %v1114_v6 = vpop.eup %1113 }
 0x18d   : > { %v829_v7 = vrot.slane %v1114_v6, %v813_v46  ;;  %v833_v1 = vrot.slane %v1114_v6, %v817_v50 }
 0x18f   : > { %v836_v9 = vmul.f32 %v829_v7, %v821_v0  ;;  %v837_v10 = vmul.f32 %v833_v1, %v822_v3  ;;  %v838_v41 = vmul.f32 %v829_v7, %v823_v4  ;;  %v839_v42 = vmul.f32 %v833_v1, %v824_v5 }
 0x191   : > { %v852_v11 = vmul.f32 %v845_v63, %v836_v9  ;;  %v853_v12 = vmul.f32 %v849_v61, %v837_v10  ;;  %v854_v13 = vmul.f32 %v845_v63, %v838_v41  ;;  %v855_v14 = vmul.f32 %v849_v61, %v839_v42 }
 0x193   : > { %v868_v15 = vadd.f32 %v861_v59, %v852_v11  ;;  %v869_v18 = vadd.f32 %v865_v8, %v853_v12  ;;  %v870_v23 = vadd.f32 %v861_v59, %v854_v13  ;;  %v871_v25 = vadd.f32 %v865_v8, %v855_v14 }
 0x195   : > { %872 = vst [vmem:[#allocation10] sm:$0xff] %v868_v15  ;;  %873 = vst [vmem:[#allocation10 + $0x8] sm:$0xff] %v869_v18 }
 0x196   : > { %874 = vst [vmem:[#allocation10 + $0x10] sm:$0xff] %v870_v23  ;;  %875 = vst [vmem:[#allocation10 + $0x18] sm:$0xff] %v871_v25 }
 0x197 PF: > { %p1023_p3 = scmp.eq.s32.totalorder %s1290_s19, 1  ;;  %s1243_s24 = smov [#allocation10]  }
 0x198   : > { %s882_s26 = sshll.u32 %s1243_s24, 4  ;;  %s883_s26 = int_to_ptr.vmem [resolvable:$true] %s882_s26 }
 0x199   : > { %s1169_s27 = scalar_lea.vmem %s883_s26, 512  ;;  %p1176_p11 = scmp.lt.s32.totalorder %s883_s26, %s883_s26 }
 0x19a   : > { %p1170_p7 = scmp.ne.s32.totalorder %s883_s26, %s1169_s27  ;;  %p1177_p12 = scmp.lt.s32.totalorder %s1169_s27, %s1169_s27 }
 0x19c   : > { %p1171_p9 = pnand %p1170_p7, %p1023_p3  ;;  %p1178_p13 = por %p1177_p12, %p1176_p11 }
 0x19e   : > { %p1172_p10 = pneg %p1171_p9 }
 0x1a0   : > { %p1179_p2 = pnand %p1178_p13, %p1172_p10 }
 0x1a2   : > { %1182 = shalt.err (!%p1179_p2)
}
 0x1a3   : > { %s1244_s28 = smov 256   ;;  %s1245_s5 = smov 16  }
 0x1a4   : > { %1009 = dma.vmem_to_hbm [thread:$0]  (%p1023_p3), %s883_s26, 512, %s1553_s4, [#allocation7], %s1244_s28, %s1244_s28, %s1245_s5  }
 0x1a5   : > { %1218 = dma.done.wait (%p1023_p3), [#allocation7], 512  }
 0x1a6   : > { %1220 = vsyncadd (%p1023_p3), [#allocation7], 4294966784 }
 0x1a7 PF: > { %p16_p4 = scmp.ge.s32.totalorder %s1316_s25, 4   ;;  %s1570_s15 = smov %s1227_s16 }
 0x1a8   : > { %s1571_s16 = smov %s1231_s17  ;;  %s1572_s17 = smov %s1336_s7 }
 0x1a9   : > { %s1573_s18 = smov %s1316_s25  ;;  %18 = sbr.rel (!%p16_p4) target bundleno = 5 (0x5), region = 86 }
 0x1ae   :  { %898 = vsyncpa [#allocation6], 1 }
 0x1af   :  { %900 = vsyncpa [#allocation6 + $0x1], 1 }
 0x1b0   :  { %901 = vsyncpa [#allocation9], 1 }
 0x1b1   :  { %902 = vsyncpa [#allocation7], 1 }
 0x1b2   :  { %904 = vsyncpa [#allocation7 + $0x1], 1 }

</bundles_post_ra>
